<compile_context>
chip_gen: v7x
topology: tpu7x:2x2x1
jax: 0.10.0
libtpu: 0.0.40
codegen_flags: <defaults>
</compile_context>

<pallas_src>
import functools

import jax
import jax.numpy as jnp
from jax.experimental import pallas as pl
from jax.experimental.pallas import tpu as pltpu


def _quick_gelu(x):
    # CLIP's default hidden_act ("quick_gelu"); f32 elementwise.
    return x * jax.nn.sigmoid(1.702 * x)


def _round_up(x, m):
    return (x + m - 1) // m * m


def _vmem_cap_bytes():
    """Per-chip VMEM ceiling with headroom (v7x: ~54 MiB, v5e/v6e: ~108 MiB)."""
    phys = 64 * 1024 * 1024
    try:
        info = pltpu.get_tpu_info()
        phys = int(getattr(info, "vmem_capacity_bytes", phys))
    except Exception:
        pass
    return max(32 * 1024 * 1024, int(phys * 0.85))


def hyp_clip_mlp_kernel(k_ref, x_ref, w1_ref, b1_ref, w2_ref, b2_ref, o_ref):
    k = k_ref[0]  # curvature (SMEM scalar, f32)

    # ---- fc1: native-dtype MXU matmul, f32 accumulation --------------------
    y = jnp.dot(x_ref[...], w1_ref[...], preferred_element_type=jnp.float32)
    y = y + b1_ref[...].astype(jnp.float32)

    # Column 0 of W1/b1 and all padded columns are zero (prepare_...), so y[:, 0] == 0
    # and padded lanes are 0.  quick_gelu(0) == 0, hence an unmasked sum of squares over
    # the full lane width equals the space-only ||.||^2 (no iota / lane mask needed).
    a = _quick_gelu(y)
    t1 = jnp.sqrt(k + jnp.sum(a * a, axis=-1, keepdims=True))  # (tm, 1) f32

    # ---- fc2: a[:, 0] == 0, so fold the time coordinate in as a rank-1 update ----
    # z = [t1, a_space] @ W2 + b2  ==  a @ W2 + t1 * W2[0, :] + b2
    # TODO(synk): for very large intermediate sizes with f32 weights on v7x (64 MiB VMEM),
    # chunk the I1 axis (extra 'arbitrary' grid axis streaming W1 column / W2 row blocks,
    # accumulating partial z and partial ||a||^2 per chunk).
    z = jnp.dot(a.astype(w2_ref.dtype), w2_ref[...], preferred_element_type=jnp.float32)
    z = z + t1 * w2_ref[0:1, :].astype(jnp.float32) + b2_ref[...].astype(jnp.float32)

    # Column 0 of W2/b2 and padded columns are zero -> z[:, 0] == 0, padded lanes 0.
    t2 = jnp.sqrt(k + jnp.sum(z * z, axis=-1, keepdims=True))  # (tm, 1) f32

    # Lane-dense unmasked store of the full tile, then a narrow column store for the
    # recomputed time coordinate (no full-tile iota/where).
    o_ref[...] = z.astype(o_ref.dtype)
    o_ref[:, 0:1] = t2.astype(o_ref.dtype)


def prepare_hyp_clip_mlp_params(w1, b1, w2, b2):
    """One-time parameter prep. Call at parameter-load time, NOT per forward.

    Zeroes the (discarded) time-output column of each LorentzLinear and zero-pads all
    parameters to lane-dense multiples of 128.  The kernel relies on these invariants
    for its mask-free sum-of-squares.
    """
    D1, I1 = w1.shape
    assert b1.shape == (I1,) and w2.shape == (I1, D1) and b2.shape == (D1,)
    D1p = _round_up(D1, 128)
    I1p = _round_up(I1, 128)

    w1 = w1.at[:, 0].set(0)
    b1 = b1.at[0].set(0)
    w2 = w2.at[:, 0].set(0)
    b2 = b2.at[0].set(0)

    w1p = jnp.pad(w1, ((0, D1p - D1), (0, I1p - I1)))
    b1p = jnp.pad(b1, (0, I1p - I1)).reshape(1, I1p)
    w2p = jnp.pad(w2, ((0, I1p - I1), (0, D1p - D1)))
    b2p = jnp.pad(b2, (0, D1p - D1)).reshape(1, D1p)
    return w1p, b1p, w2p, b2p


@functools.partial(jax.jit, static_argnames=("tm",))
def hyp_clip_mlp(x, k, w1p, b1p, w2p, b2p, *, tm=256):
    """x: (..., hidden_size+1); (w1p, b1p, w2p, b2p) from prepare_hyp_clip_mlp_params.
    k: manifold curvature (scalar, may differ from 1 / be learnable)."""
    *lead, D1 = x.shape
    D1p, I1p = w1p.shape
    assert w2p.shape == (I1p, D1p) and b1p.shape == (1, I1p) and b2p.shape == (1, D1p)
    assert D1 <= D1p

    M = 1
    for d in lead:
        M *= d

    # Row tile: multiple of 16 (bf16-safe sublane packing); don't over-pad tiny inputs.
    M16 = _round_up(max(M, 1), 16)
    tm = max(16, min(_round_up(tm, 16), M16))
    # Guarantee >= 2 grid steps when there is enough work, so the 'parallel' M axis
    # actually shards across v7x's two TensorCores (and pipelining engages).
    if (M16 + tm - 1) // tm < 2 and M16 >= 32:
        tm = max(16, _round_up((M16 + 1) // 2, 16))
    M_pad = _round_up(M, tm)

    x2 = jnp.pad(x.reshape(M, D1), ((0, M_pad - M), (0, D1p - D1)))
    k_arr = jnp.asarray(k, jnp.float32).reshape(1)

    # --- VMEM budget: single-buffered resident weights + double-buffered I/O tiles ---
    wbytes = jnp.dtype(w1p.dtype).itemsize
    xbytes = jnp.dtype(x.dtype).itemsize
    weights_bytes = (D1p * I1p + I1p * D1p + I1p + D1p) * wbytes   # x1 (Buffered(1))
    io_bytes = 2 * 2 * tm * D1p * xbytes                           # x + out, x2 buffers
    interm_bytes = 4 * tm * (2 * I1p + 2 * D1p)                    # f32 temporaries
    vmem_needed = weights_bytes + io_bytes + interm_bytes
    vmem_limit = int(min(max(int(1.25 * vmem_needed), 32 * 1024 * 1024), _vmem_cap_bytes()))

    cost = pl.CostEstimate(
        flops=2 * M_pad * (D1p * I1p + I1p * D1p),
        transcendentals=M_pad * (I1p + 2),
        bytes_accessed=2 * M_pad * D1p * xbytes + weights_bytes,
    )

    resident = dict(pipeline_mode=pl.Buffered(buffer_count=1))  # fetched once; no double-buffer
    out = pl.pallas_call(
        hyp_clip_mlp_kernel,
        out_shape=jax.ShapeDtypeStruct((M_pad, D1p), x.dtype),
        grid_spec=pltpu.PrefetchScalarGridSpec(
            num_scalar_prefetch=0,
            grid=(M_pad // tm,),
            in_specs=[
                pl.BlockSpec(memory_space=pltpu.MemorySpace.SMEM),         # k (scalar)
                pl.BlockSpec((tm, D1p), lambda i: (i, 0)),                 # x row-tile (pipelined)
                pl.BlockSpec((D1p, I1p), lambda i: (0, 0), **resident),    # W1 (resident)
                pl.BlockSpec((1, I1p), lambda i: (0, 0), **resident),      # b1 (resident)
                pl.BlockSpec((I1p, D1p), lambda i: (0, 0), **resident),    # W2 (resident)
                pl.BlockSpec((1, D1p), lambda i: (0, 0), **resident),      # b2 (resident)
            ],
            out_specs=pl.BlockSpec((tm, D1p), lambda i: (i, 0)),
        ),
        compiler_params=pltpu.CompilerParams(
            dimension_semantics=("parallel",),
            vmem_limit_bytes=vmem_limit,
        ),
        cost_estimate=cost,
    )(k_arr, x2, w1p, b1p, w2p, b2p)

    return out[:M, :D1].reshape(*lead, D1)


def _reference(x, w1, b1, w2, b2, *, k=1.0):
    """Pure-JAX reference with identical semantics (for a sanity check)."""
    y = x @ w1 + b1
    hs = _quick_gelu(y[..., 1:])
    ht = jnp.sqrt(k + jnp.sum(hs * hs, axis=-1, keepdims=True))
    h = jnp.concatenate([ht, hs], axis=-1)
    z = h @ w2 + b2
    zs = z[..., 1:]
    zt = jnp.sqrt(k + jnp.sum(zs * zs, axis=-1, keepdims=True))
    return jnp.concatenate([zt, zs], axis=-1)


if __name__ == "__main__":
    # Small shapes consistent with the module: hidden_size=32, intermediate_size=64.
    B, S = 2, 8
    hidden_size, intermediate_size = 32, 64
    D1, I1 = hidden_size + 1, intermediate_size + 1
    K = 1.0

    key = jax.random.PRNGKey(0)
    kx, kw1, kb1, kw2, kb2 = jax.random.split(key, 5)

    # Input: points on the Lorentz hyperboloid (time coord at index 0).
    x_space = 0.5 * jax.random.normal(kx, (B, S, hidden_size), dtype=jnp.float32)
    x_time = jnp.sqrt(K + jnp.sum(x_space * x_space, axis=-1, keepdims=True))
    x = jnp.concatenate([x_time, x_space], axis=-1)  # (B, S, D1)

    # Deterministic synthetic parameters (nn.Linear-style, stored as (in, out)).
    w1 = 0.02 * jax.random.normal(kw1, (D1, I1), dtype=jnp.float32)
    b1 = 0.02 * jax.random.normal(kb1, (I1,), dtype=jnp.float32)
    w2 = 0.02 * jax.random.normal(kw2, (I1, D1), dtype=jnp.float32)
    b2 = 0.02 * jax.random.normal(kb2, (D1,), dtype=jnp.float32)

    # One-time parameter prep (hoisted out of the per-forward path).
    params_f32 = prepare_hyp_clip_mlp_params(w1, b1, w2, b2)

    # f32 path (tight check).
    out = jax.block_until_ready(hyp_clip_mlp(x, K, *params_f32))
    ref = _reference(x, w1, b1, w2, b2, k=K)
    assert out.shape == (B, S, D1)
    assert jnp.allclose(out, ref, atol=1e-4, rtol=1e-4), "f32 mismatch vs JAX reference"

    # Curvature k != 1 (runtime scalar, no recompile).
    K2 = 0.7
    out2 = jax.block_until_ready(hyp_clip_mlp(x, K2, *params_f32))
    ref2 = _reference(x, w1, b1, w2, b2, k=K2)
    assert jnp.allclose(out2, ref2, atol=1e-4, rtol=1e-4), "k!=1 mismatch vs JAX reference"

    # bf16 path: native bf16 MXU operands with f32 accumulation (loose check).
    xb = x.astype(jnp.bfloat16)
    w1b, b1b, w2b, b2b = (a.astype(jnp.bfloat16) for a in (w1, b1, w2, b2))
    params_bf16 = prepare_hyp_clip_mlp_params(w1b, b1b, w2b, b2b)
    out_bf = jax.block_until_ready(hyp_clip_mlp(xb, K, *params_bf16))
    ref_bf = _reference(
        xb.astype(jnp.float32), w1b.astype(jnp.float32), b1b.astype(jnp.float32),
        w2b.astype(jnp.float32), b2b.astype(jnp.float32), k=K)
    assert out_bf.shape == (B, S, D1)
    assert jnp.allclose(out_bf.astype(jnp.float32), ref_bf, atol=2e-2, rtol=2e-2), \
        "bf16 mismatch vs JAX reference"

    print("KERNEL_OK")
</pallas_src>

<mosaic_0001>
module attributes {stable_mosaic.version = 11 : i64} {
  func.func @hyp_clip_mlp_kernel(%arg0: i32, %arg1: memref<1xf32, #tpu.memory_space<smem>>, %arg2: memref<16x128xf32, #tpu.memory_space<vmem>>, %arg3: memref<128x128xf32, #tpu.memory_space<vmem>>, %arg4: memref<1x128xf32, #tpu.memory_space<vmem>>, %arg5: memref<128x128xf32, #tpu.memory_space<vmem>>, %arg6: memref<1x128xf32, #tpu.memory_space<vmem>>, %arg7: memref<16x128xf32, #tpu.memory_space<vmem>>) attributes {dimension_semantics = [#tpu.dimension_semantics<parallel>], iteration_bounds = array<i64: 1>, scalar_prefetch = 0 : i64, scratch_operands = 0 : i64, tpu.core_type = #tpu.core_type<tc>, window_params = [{transform_indices = @transform_0, window_bounds = array<i64: 1>}, {transform_indices = @transform_1, window_bounds = array<i64: 16, 128>}, {pipeline_mode = #tpu.pipeline_mode<synchronous>, transform_indices = @transform_2, window_bounds = array<i64: 128, 128>}, {pipeline_mode = #tpu.pipeline_mode<synchronous>, transform_indices = @transform_3, window_bounds = array<i64: 1, 128>}, {pipeline_mode = #tpu.pipeline_mode<synchronous>, transform_indices = @transform_4, window_bounds = array<i64: 128, 128>}, {pipeline_mode = #tpu.pipeline_mode<synchronous>, transform_indices = @transform_5, window_bounds = array<i64: 1, 128>}, {transform_indices = @transform_6, window_bounds = array<i64: 16, 128>}]} {
    %c0 = arith.constant 0 : index
    %0 = memref.load %arg1[%c0] : memref<1xf32, #tpu.memory_space<smem>>
    %c0_0 = arith.constant 0 : index
    %c0_1 = arith.constant 0 : index
    %1 = vector.load %arg2[%c0_0, %c0_1] : memref<16x128xf32, #tpu.memory_space<vmem>>, vector<16x128xf32>
    %c0_2 = arith.constant 0 : index
    %c0_3 = arith.constant 0 : index
    %2 = vector.load %arg3[%c0_2, %c0_3] : memref<128x128xf32, #tpu.memory_space<vmem>>, vector<128x128xf32>
    %cst = arith.constant dense<0.000000e+00> : vector<16x128xf32>
    %3 = tpu.matmul %1, %2, %cst {dimension_numbers = #tpu.dot_dimension_numbers<[1], [0], [0], [1], [0, 0, 1, 1], [], []>} : vector<16x128xf32>, vector<128x128xf32>, vector<16x128xf32> -> vector<16x128xf32>
    %c0_4 = arith.constant 0 : index
    %c0_5 = arith.constant 0 : index
    %4 = vector.load %arg4[%c0_4, %c0_5] : memref<1x128xf32, #tpu.memory_space<vmem>>, vector<1x128xf32>
    %5 = vector.broadcast %4 : vector<1x128xf32> to vector<16x128xf32>
    %6 = arith.addf %3, %5 : vector<16x128xf32>
    %cst_6 = arith.constant 1.702000e+00 : f32
    %7 = vector.broadcast %cst_6 : f32 to vector<16x128xf32>
    %8 = arith.mulf %7, %6 : vector<16x128xf32>
    %9 = arith.negf %8 : vector<16x128xf32>
    %10 = math.exp %9 : vector<16x128xf32>
    %cst_7 = arith.constant 1.000000e+00 : f32
    %11 = vector.broadcast %cst_7 : f32 to vector<16x128xf32>
    %12 = arith.addf %11, %10 : vector<16x128xf32>
    %13 = arith.divf %11, %12 : vector<16x128xf32>
    %14 = arith.mulf %6, %13 : vector<16x128xf32>
    %15 = arith.mulf %14, %14 : vector<16x128xf32>
    %cst_8 = arith.constant dense<0.000000e+00> : vector<16xf32>
    %16 = vector.multi_reduction <add>, %15, %cst_8 [1] : vector<16x128xf32> to vector<16xf32>
    %17 = vector.shape_cast %16 : vector<16xf32> to vector<16x1xf32>
    %18 = vector.broadcast %0 : f32 to vector<16x1xf32>
    %19 = arith.addf %18, %17 : vector<16x1xf32>
    %20 = math.sqrt %19 : vector<16x1xf32>
    %c0_9 = arith.constant 0 : index
    %c0_10 = arith.constant 0 : index
    %21 = vector.load %arg5[%c0_9, %c0_10] : memref<128x128xf32, #tpu.memory_space<vmem>>, vector<128x128xf32>
    %cst_11 = arith.constant dense<0.000000e+00> : vector<16x128xf32>
    %22 = tpu.matmul %14, %21, %cst_11 {dimension_numbers = #tpu.dot_dimension_numbers<[1], [0], [0], [1], [0, 0, 1, 1], [], []>} : vector<16x128xf32>, vector<128x128xf32>, vector<16x128xf32> -> vector<16x128xf32>
    %c0_12 = arith.constant 0 : index
    %c0_13 = arith.constant 0 : index
    %23 = vector.load %arg5[%c0_12, %c0_13] : memref<128x128xf32, #tpu.memory_space<vmem>>, vector<1x128xf32>
    %24 = vector.broadcast %20 : vector<16x1xf32> to vector<16x128xf32>
    %25 = vector.broadcast %23 : vector<1x128xf32> to vector<16x128xf32>
    %26 = arith.mulf %24, %25 : vector<16x128xf32>
    %27 = arith.addf %22, %26 : vector<16x128xf32>
    %c0_14 = arith.constant 0 : index
    %c0_15 = arith.constant 0 : index
    %28 = vector.load %arg6[%c0_14, %c0_15] : memref<1x128xf32, #tpu.memory_space<vmem>>, vector<1x128xf32>
    %29 = vector.broadcast %28 : vector<1x128xf32> to vector<16x128xf32>
    %30 = arith.addf %27, %29 : vector<16x128xf32>
    %31 = arith.mulf %30, %30 : vector<16x128xf32>
    %cst_16 = arith.constant dense<0.000000e+00> : vector<16xf32>
    %32 = vector.multi_reduction <add>, %31, %cst_16 [1] : vector<16x128xf32> to vector<16xf32>
    %33 = vector.shape_cast %32 : vector<16xf32> to vector<16x1xf32>
    %34 = vector.broadcast %0 : f32 to vector<16x1xf32>
    %35 = arith.addf %34, %33 : vector<16x1xf32>
    %36 = math.sqrt %35 : vector<16x1xf32>
    %c0_17 = arith.constant 0 : index
    %c0_18 = arith.constant 0 : index
    %37 = vector.load %arg7[%c0_17, %c0_18] : memref<16x128xf32, #tpu.memory_space<vmem>>, vector<16x128xf32>
    tpu.vector_store %arg7[%c0_17, %c0_18], %30 {strides = array<i32>} : memref<16x128xf32, #tpu.memory_space<vmem>>, vector<16x128xf32>,
    %c0_19 = arith.constant 0 : index
    %c0_20 = arith.constant 0 : index
    %38 = vector.load %arg7[%c0_19, %c0_20] : memref<16x128xf32, #tpu.memory_space<vmem>>, vector<16x1xf32>
    tpu.vector_store %arg7[%c0_19, %c0_20], %36 {strides = array<i32>} : memref<16x128xf32, #tpu.memory_space<vmem>>, vector<16x1xf32>,
    return
  }
  func.func @transform_0(%arg0: i32) -> i32 {
    %c0_i32 = arith.constant 0 : i32
    %c0_i32_0 = arith.constant 0 : i32
    return %c0_i32 : i32
  }
  func.func @transform_1(%arg0: i32) -> (i32, i32) {
    %c0_i32 = arith.constant 0 : i32
    %c0_i32_0 = arith.constant 0 : i32
    return %arg0, %c0_i32 : i32, i32
  }
  func.func @transform_2(%arg0: i32) -> (i32, i32) {
    %c0_i32 = arith.constant 0 : i32
    %c0_i32_0 = arith.constant 0 : i32
    %c0_i32_1 = arith.constant 0 : i32
    return %c0_i32, %c0_i32_0 : i32, i32
  }
  func.func @transform_3(%arg0: i32) -> (i32, i32) {
    %c0_i32 = arith.constant 0 : i32
    %c0_i32_0 = arith.constant 0 : i32
    %c0_i32_1 = arith.constant 0 : i32
    return %c0_i32, %c0_i32_0 : i32, i32
  }
  func.func @transform_4(%arg0: i32) -> (i32, i32) {
    %c0_i32 = arith.constant 0 : i32
    %c0_i32_0 = arith.constant 0 : i32
    %c0_i32_1 = arith.constant 0 : i32
    return %c0_i32, %c0_i32_0 : i32, i32
  }
  func.func @transform_5(%arg0: i32) -> (i32, i32) {
    %c0_i32 = arith.constant 0 : i32
    %c0_i32_0 = arith.constant 0 : i32
    %c0_i32_1 = arith.constant 0 : i32
    return %c0_i32, %c0_i32_0 : i32, i32
  }
  func.func @transform_6(%arg0: i32) -> (i32, i32) {
    %c0_i32 = arith.constant 0 : i32
    %c0_i32_0 = arith.constant 0 : i32
    return %arg0, %c0_i32 : i32, i32
  }
}

</mosaic_0001>

<bundles_post_ra>
// kernel: hyp_clip_mlp.1
= control target key start
LH: loop header
LB: loop body
LE: loop exit
PB: predicated region body
PF: predicated region fallthrough
CT: control target
= control target key end

     0   :  { %12 = vsyncpa [#allocation4], 0  ;;  %s665_s0 = inlined_call_operand.<no memory space> [shape: f32[1], index: 0, kind: input, shape index: {}]   ;;  %s666_s1 = inlined_call_operand.vmem [shape: f32[16,128], index: 1, kind: input, shape index: {}]   ;;  %s667_s2 = inlined_call_operand.hbm [shape: f32[128,128], index: 2, kind: input, shape index: {}]   ;;  %s668_s3 = inlined_call_operand.vmem [shape: f32[1,128], index: 3, kind: input, shape index: {}]   ;;  %s669_s4 = inlined_call_operand.hbm [shape: f32[128,128], index: 4, kind: input, shape index: {}]   ;;  %s670_s5 = inlined_call_operand.vmem [shape: f32[1,128], index: 5, kind: input, shape index: {}]   ;;  %s671_s6 = inlined_call_operand.vmem [shape: f32[16,128], index: 6, kind: output, shape index: {}]  }
   0x1   :  { %13 = vsyncpa [#allocation6], 0  ;;  %s575_s21 = smov [#allocation3]   ;;  %s527_s25 = scalar_lea.hbm %s667_s2, 2048 }
   0x2   :  { %s23_s22 = sshll.u32 %s575_s21, 4  ;;  %p528_p0 = scmp.ne.s32.totalorder %s667_s2, %s527_s25  ;;  %s24_s22 = int_to_ptr.vmem [resolvable:$true] %s23_s22 }
   0x3   :  { %p531_p1 = scmp.lt.u32.totalorder %s527_s25, %s667_s2 }
   0x5   :  { %p533_p2 = pnand %p531_p1, %p528_p0 }
   0x7   :  { %536 = shalt.err (!%p533_p2)
}
   0x8   :  { %s537_s30 = scalar_lea.vmem %s24_s22, 2048  ;;  %p542_p4 = scmp.lt.s32.totalorder %s24_s22, %s24_s22 }
   0x9   :  { %p538_p3 = scmp.ne.s32.totalorder %s24_s22, %s537_s30  ;;  %p543_p5 = scmp.lt.s32.totalorder %s537_s30, %s537_s30 }
   0xb   :  { %p544_p6 = por %p543_p5, %p542_p4 }
   0xd   :  { %p545_p7 = pnand %p544_p6, %p538_p3 }
   0xf   :  { %548 = shalt.err (!%p545_p7)
}
  0x10   :  { %s576_s7 = smov 128   ;;  %s577_s8 = smov 8  }
  0x11   :  { %29 = dma.hbm_to_vmem [thread:$0]  %s667_s2, 2048, %s24_s22, [#allocation4], %s576_s7, %s576_s7, %s577_s8  }
  0x12   :  { %s578_s11 = smov [#allocation5]   ;;  %s549_s15 = scalar_lea.hbm %s669_s4, 2048 }
  0x13   :  { %s37_s12 = sshll.u32 %s578_s11, 4  ;;  %p550_p8 = scmp.ne.s32.totalorder %s669_s4, %s549_s15  ;;  %s38_s12 = int_to_ptr.vmem [resolvable:$true] %s37_s12 }
  0x14   :  { %p553_p9 = scmp.lt.u32.totalorder %s549_s15, %s669_s4 }
  0x16   :  { %p555_p10 = pnand %p553_p9, %p550_p8 }
  0x18   :  { %558 = shalt.err (!%p555_p10)
}
  0x19   :  { %s559_s20 = scalar_lea.vmem %s38_s12, 2048  ;;  %p564_p12 = scmp.lt.s32.totalorder %s38_s12, %s38_s12 }
  0x1a   :  { %p560_p11 = scmp.ne.s32.totalorder %s38_s12, %s559_s20  ;;  %p565_p13 = scmp.lt.s32.totalorder %s559_s20, %s559_s20 }
  0x1c   :  { %p566_p0 = por %p565_p13, %p564_p12 }
  0x1e   :  { %p567_p1 = pnand %p566_p0, %p560_p11 }
  0x20   :  { %570 = shalt.err (!%p567_p1)
}
  0x21   :  { %43 = dma.hbm_to_vmem [thread:$0]  %s669_s4, 2048, %s38_s12, [#allocation6], %s576_s7, %s576_s7, %s577_s8  }
  0x22   :  { %571 = dma.done.wait [#allocation4], 2048  }
  0x23   :  { %572 = vsyncadd [#allocation4], 4294965248 }
  0x24   :  { %573 = dma.done.wait [#allocation6], 2048  }
  0x25   :  { %574 = vsyncadd [#allocation6], 4294965248  ;;  %v55_v0 = vld [vmem:[#allocation3] sm:$0xff]  ;;  %v56_v1 = vld [vmem:[#allocation3 + $0x8] sm:$0xff]  ;;  %vm323_vm4 = vcmask 7168  }
  0x26   :  { %v57_v2 = vld [vmem:[#allocation3 + $0x10] sm:$0xff]  ;;  %v443_v3 = vpack.c.bf16 %v56_v1, %v55_v0  ;;  %v58_v4 = vld [vmem:[#allocation3 + $0x18] sm:$0xff]  ;;  %v59_v6 = vld [vmem:[#allocation3 + $0x20] sm:$0xff] }
  0x27   :  { %v447_v5 = vpack.c.bf16 %v58_v4, %v57_v2  ;;  %v60_v7 = vld [vmem:[#allocation3 + $0x28] sm:$0xff]  ;;  %v53_v9 = vld [vmem:[%s666_s1] sm:$0xff]  ;;  %v61_v10 = vld [vmem:[#allocation3 + $0x30] sm:$0xff] }
  0x28   :  { %444 = vmatprep.subr.bf16.mxu0 %v443_v3  ;;  %v451_v8 = vpack.c.bf16 %v60_v7, %v59_v6  ;;  %v62_v11 = vld [vmem:[#allocation3 + $0x38] sm:$0xff]  ;;  %405 = vmatprep.mubr.f32.mxu0 %v53_v9  ;;  %v63_v13 = vld [vmem:[#allocation3 + $0x40] sm:$0xff]  ;;  %v64_v14 = vld [vmem:[#allocation3 + $0x48] sm:$0xff]  ;;  %v175_v7 = vstv %s665_s0 }
  0x29   :  { %446 = vmatpush3.bf16.msra.mxu0 %v443_v3  ;;  %v455_v12 = vpack.c.bf16 %v62_v11, %v61_v10  ;;  %v459_v15 = vpack.c.bf16 %v64_v14, %v63_v13  ;;  %v65_v16 = vld [vmem:[#allocation3 + $0x50] sm:$0xff]  ;;  %v66_v17 = vld [vmem:[#allocation3 + $0x58] sm:$0xff]  ;;  %v67_v19 = vld [vmem:[#allocation3 + $0x60] sm:$0xff] }
  0x2a   :  { %448 = vmatprep.subr.bf16.mxu0 %v447_v5  ;;  %v463_v18 = vpack.c.bf16 %v66_v17, %v65_v16  ;;  %v68_v20 = vld [vmem:[#allocation3 + $0x68] sm:$0xff]  ;;  %v69_v22 = vld [vmem:[#allocation3 + $0x70] sm:$0xff]  ;;  %v70_v23 = vld [vmem:[#allocation3 + $0x78] sm:$0xff] }
  0x2b   :  { %v467_v21 = vpack.c.bf16 %v68_v20, %v67_v19  ;;  %v471_v24 = vpack.c.bf16 %v70_v23, %v69_v22  ;;  %v54_v25 = vld [vmem:[%s666_s1 + $0x8] sm:$0xff]  ;;  %v192_v26 = vld [vmem:[#allocation5] sm:$0xff]  ;;  %v194_v29 = vld [vmem:[#allocation5 + $0x10] sm:$0xff] }
  0x2c   :  { %v193_v27 = vld [vmem:[#allocation5 + $0x8] sm:$0xff]  ;;  %v195_v30 = vld [vmem:[#allocation5 + $0x18] sm:$0xff]  ;;  %v196_v32 = vld [vmem:[#allocation5 + $0x20] sm:$0xff] }
  0x2d   :  { %450 = vmatpush3.bf16.msra.mxu0 %v447_v5  ;;  %v475_v28 = vpack.c.bf16 %v193_v27, %v192_v26  ;;  %v479_v31 = vpack.c.bf16 %v195_v30, %v194_v29  ;;  %v197_v33 = vld [vmem:[#allocation5 + $0x28] sm:$0xff]  ;;  %v198_v35 = vld [vmem:[#allocation5 + $0x30] sm:$0xff]  ;;  %v199_v36 = vld [vmem:[#allocation5 + $0x38] sm:$0xff] }
  0x2e   :  { %452 = vmatprep.subr.bf16.mxu0 %v451_v8  ;;  %v483_v34 = vpack.c.bf16 %v197_v33, %v196_v32  ;;  %v487_v37 = vpack.c.bf16 %v199_v36, %v198_v35  ;;  %v200_v38 = vld [vmem:[#allocation5 + $0x40] sm:$0xff]  ;;  %v201_v39 = vld [vmem:[#allocation5 + $0x48] sm:$0xff]  ;;  %v202_v41 = vld [vmem:[#allocation5 + $0x50] sm:$0xff] }
  0x2f   :  { %476 = vmatprep.subr.bf16.mxu1 %v475_v28  ;;  %v491_v40 = vpack.c.bf16 %v201_v39, %v200_v38  ;;  %v203_v42 = vld [vmem:[#allocation5 + $0x58] sm:$0xff]  ;;  %v204_v44 = vld [vmem:[#allocation5 + $0x60] sm:$0xff]  ;;  %v205_v45 = vld [vmem:[#allocation5 + $0x68] sm:$0xff] }
  0x30   :  { %478 = vmatpush3.bf16.msra.mxu1 %v475_v28  ;;  %v495_v43 = vpack.c.bf16 %v203_v42, %v202_v41  ;;  %v499_v46 = vpack.c.bf16 %v205_v45, %v204_v44  ;;  %v206_v47 = vld [vmem:[#allocation5 + $0x70] sm:$0xff]  ;;  %v207_v48 = vld [vmem:[#allocation5 + $0x78] sm:$0xff]  ;;  %v332_v50 = vld [vmem:[%s668_s3] ss:$0 sm:$0xff] }
  0x31   :  { %454 = vmatpush3.bf16.msra.mxu0 %v451_v8  ;;  %480 = vmatprep.subr.bf16.mxu1 %v479_v31  ;;  %v503_v49 = vpack.c.bf16 %v207_v48, %v206_v47  ;;  %v335_v19 = vld [vmem:[#allocation5] ss:$0 sm:$0xff] }
  0x32   :  { %456 = vmatprep.subr.bf16.mxu0 %v455_v12  ;;  %v336_v23 = vld [vmem:[%s670_s5] ss:$0 sm:$0xff] }
  0x34   :  { %482 = vmatpush3.bf16.msra.mxu1 %v479_v31 }
  0x35   :  { %458 = vmatpush3.bf16.msra.mxu0 %v455_v12  ;;  %484 = vmatprep.subr.bf16.mxu1 %v483_v34 }
  0x36   :  { %460 = vmatprep.subr.bf16.mxu0 %v459_v15 }
  0x38   :  { %486 = vmatpush3.bf16.msra.mxu1 %v483_v34 }
  0x39   :  { %462 = vmatpush3.bf16.msra.mxu0 %v459_v15  ;;  %488 = vmatprep.subr.bf16.mxu1 %v487_v37 }
  0x3a   :  { %464 = vmatprep.subr.bf16.mxu0 %v463_v18 }
  0x3c   :  { %490 = vmatpush3.bf16.msra.mxu1 %v487_v37 }
  0x3d   :  { %466 = vmatpush3.bf16.msra.mxu0 %v463_v18  ;;  %492 = vmatprep.subr.bf16.mxu1 %v491_v40 }
  0x3e   :  { %468 = vmatprep.subr.bf16.mxu0 %v467_v21 }
  0x40   :  { %494 = vmatpush3.bf16.msra.mxu1 %v491_v40 }
  0x41   :  { %470 = vmatpush3.bf16.msra.mxu0 %v467_v21  ;;  %496 = vmatprep.subr.bf16.mxu1 %v495_v43 }
  0x42   :  { %472 = vmatprep.subr.bf16.mxu0 %v471_v24 }
  0x44   :  { %498 = vmatpush3.bf16.msra.mxu1 %v495_v43 }
  0x45   :  { %474 = vmatpush3.bf16.msra.mxu0 %v471_v24  ;;  %500 = vmatprep.subr.bf16.mxu1 %v499_v46 }
  0x48   :  { %406 = vmatmul.mubr.f32.vlgmr.msra.gmra.mrb[0].mxu0 %v54_v25  ;;  %502 = vmatpush3.bf16.msra.mxu1 %v499_v46 }
  0x49   :  { %504 = vmatprep.subr.bf16.mxu1 %v503_v49 }
  0x4c   :  { %506 = vmatpush3.bf16.msra.mxu1 %v503_v49 }
 0x11b   :  { %v407_v51 = vpop.f32.mrb[0].mxu0 }
 0x11c   :  { %v150_v52 = vadd.f32 %v407_v51, %v332_v50  ;;  %v144_v53 = vpop.f32.mrb[1].mxu0 }
 0x11d   :  { %v145_v54 = vadd.f32 %v332_v50, %v144_v53 }
 0x11e   :  { %v334_v55 = vmul.f32 -1.702, %v150_v52 }
 0x11f   :  { %v333_v56 = vmul.f32 -1.702, %v145_v54 }
 0x120   :  { %v159_v57 = vmul.f32 1.442695, %v334_v55 }
 0x121   :  { %v157_v58 = vmul.f32 1.442695, %v333_v56 }
 0x122   :  { %511 = vpow2.f32 %v159_v57 }
 0x123   :  { %513 = vpow2.f32 %v157_v58 }
 0x12c   :  { %v512_v59 = vpop.eup %511 }
 0x12d   :  { %v514_v60 = vpop.eup %513  ;;  %v162_v61 = vadd.f32 1.0, %v512_v59 }
 0x12e   :  { %v161_v62 = vadd.f32 1.0, %v514_v60 }
 0x12f   :  { %515 = vrcp.f32 %v162_v61 }
 0x130   :  { %517 = vrcp.f32 %v161_v62 }
 0x139   :  { %v516_v63 = vpop.eup %515 }
 0x13a   :  { %v518_v0 = vpop.eup %517  ;;  %v168_v2 = vmul.f32 %v516_v63, %v150_v52 }
 0x13b   :  { %v167_v1 = vmul.f32 %v518_v0, %v145_v54 }
 0x13c   :  { %v170_v4 = vmul.f32 %v168_v2, %v168_v2 }
 0x13d   :  { %440 = vmatprep.mubr.f32.mxu1 %v167_v1  ;;  %v169_v3 = vmul.f32 %v167_v1, %v167_v1 }
 0x13e   :  { %441 = vmatmul.mubr.f32.vlgmr.msra.gmra.mrb[0].mxu1 %v168_v2 }
 0x13f   :  { %171 = vadd.xlane.f32.xlu0 %v169_v3 }
 0x143   :  { %173 = vadd.xlane.f32.xlu0 %v170_v4 }
 0x1cc   :  { %v172_v5 = vpop.xlane.xlu0 %171 }
 0x1cd   :  { %v176_v9 = vadd.f32 %v175_v7, %v172_v5 }
 0x1cf   :  { %vm180_vm1 = vcmp.eq.f32.partialorder %v176_v9, inf  ;;  %v183_v17 = vand.u32 2147483648, %v176_v9  ;;  %vm182_vm3 = vcmp.eq.f32.partialorder %v176_v9, 0.0 }
 0x1d0   :  { %v174_v6 = vpop.xlane.xlu0 %173 }
 0x1d1   :  { %v177_v8 = vadd.f32 %v175_v7, %v174_v6 }
 0x1d3   :  { %519 = vrsqrt.f32 %v177_v8  ;;  %vm187_vm0 = vcmp.eq.f32.partialorder %v177_v8, inf  ;;  %v190_v15 = vand.u32 2147483648, %v177_v8  ;;  %vm189_vm2 = vcmp.eq.f32.partialorder %v177_v8, 0.0 }
 0x1d4   :  { %521 = vrsqrt.f32 %v176_v9 }
 0x1dd   :  { %v520_v10 = vpop.eup %519 }
 0x1de   :  { %v522_v11 = vpop.eup %521  ;;  %v186_v12 = vmul.f32 %v520_v10, %v177_v8 }
 0x1df   :  { %v179_v13 = vmul.f32 %v522_v11, %v176_v9 }
 0x1e0   :  { %v188_v14 = vsel %vm187_vm0, %v177_v8, %v186_v12 }
 0x1e1   :  { %v181_v16 = vsel %vm180_vm1, %v176_v9, %v179_v13  ;;  %v191_v18 = vsel %vm189_vm2, %v190_v15, %v188_v14 }
 0x1e2   :  { %v184_v20 = vsel %vm182_vm3, %v183_v17, %v181_v16  ;;  %v214_v21 = vmul.f32 %v335_v19, %v191_v18 }
 0x1e3   :  { %v213_v24 = vmul.f32 %v335_v19, %v184_v20 }
 0x211   :  { %v442_v22 = vpop.f32.mrb[0].mxu1 }
 0x212   :  { %v287_v25 = vadd.f32 %v442_v22, %v214_v21  ;;  %v281_v26 = vpop.f32.mrb[1].mxu1 }
 0x213   :  { %v282_v27 = vadd.f32 %v281_v26, %v213_v24 }
 0x214   :  { %v298_v28 = vadd.f32 %v336_v23, %v287_v25 }
 0x215   :  { %v297_v29 = vadd.f32 %v336_v23, %v282_v27 }
 0x216   :  { %322 = vst [vmem:[%s671_s6 + $0x8] sm:$0xff] %v298_v28  ;;  %v300_v31 = vmul.f32 %v298_v28, %v298_v28 }
 0x217   :  { %v299_v30 = vmul.f32 %v297_v29, %v297_v29  ;;  %321 = vst [vmem:[%s671_s6] sm:$0xff] %v297_v29 }
 0x219   :  { %301 = vadd.xlane.f32.xlu1 %v299_v30 }
 0x21d   :  { %303 = vadd.xlane.f32.xlu1 %v300_v31 }
 0x2a6   :  { %v302_v32 = vpop.xlane.xlu1 %301 }
 0x2a7   :  { %v305_v33 = vadd.f32 %v302_v32, %v175_v7 }
 0x2a9   :  { %523 = vrsqrt.f32 %v305_v33  ;;  %vm309_vm5 = vcmp.eq.f32.partialorder %v305_v33, inf  ;;  %v312_v38 = vand.u32 2147483648, %v305_v33  ;;  %vm311_vm6 = vcmp.eq.f32.partialorder %v305_v33, 0.0 }
 0x2aa   :  { %v304_v34 = vpop.xlane.xlu1 %303 }
 0x2ab   :  { %v306_v35 = vadd.f32 %v304_v34, %v175_v7 }
 0x2ad   :  { %525 = vrsqrt.f32 %v306_v35  ;;  %vm316_vm7 = vcmp.eq.f32.partialorder %v306_v35, inf  ;;  %v319_v43 = vand.u32 2147483648, %v306_v35  ;;  %vm318_vm8 = vcmp.eq.f32.partialorder %v306_v35, 0.0 }
 0x2b3   :  { %v524_v36 = vpop.eup %523 }
 0x2b4   :  { %v308_v37 = vmul.f32 %v524_v36, %v305_v33 }
 0x2b6   :  { %v310_v39 = vsel %vm309_vm5, %v305_v33, %v308_v37 }
 0x2b7   :  { %v526_v40 = vpop.eup %525  ;;  %v313_v41 = vsel %vm311_vm6, %v312_v38, %v310_v39 }
 0x2b8   :  { %324 = vst.msk [vmem:[%s671_s6] sm:$0xff] %vm323_vm4, %v313_v41  ;;  %v315_v42 = vmul.f32 %v526_v40, %v306_v35 }
 0x2ba   :  { %v317_v44 = vsel %vm316_vm7, %v306_v35, %v315_v42 }
 0x2bb   :  { %v320_v45 = vsel %vm318_vm8, %v319_v43, %v317_v44 }
 0x2bc   :  { %325 = vst.msk [vmem:[%s671_s6 + $0x8] sm:$0xff] %vm323_vm4, %v320_v45 }
 0x2bd   :  { %330 = vsyncpa [#allocation4], 1 }
 0x2be   :  { %331 = vsyncpa [#allocation6], 1 }

</bundles_post_ra>
